<compile_context>
chip_gen: v6e
topology: v6e:2x2x1
jax: 0.10.0
libtpu: 0.0.40
codegen_flags: <defaults>
</compile_context>

<pallas_src>
import functools

import jax
import jax.numpy as jnp
import numpy as np
from jax.experimental import pallas as pl
from jax.experimental.pallas import tpu as pltpu

_EPS32 = float(np.finfo(np.float32).eps)   # torch.finfo(torch.float32).eps
_EPS6 = 1e-6                               # module-level `eps` in saliency_losses.py


def _ssum(x):
    """Per-image sum over the two spatial axes -> (bt, 1, 1)."""
    return jnp.sum(jnp.sum(x, axis=-1, keepdims=True), axis=-2, keepdims=True)


def _saliency_kernel(pred_ref, gts_ref, mask_ref,
                     kl_ref, ccn_ref, ccpp_ref, cctt_ref, nss_ref,
                     *, n, use_smse):
    """Batched partial losses for one (bt, R, C) block of images."""
    inv_n = 1.0 / n
    inv_nm1 = 1.0 / (n - 1.0)

    pred = pred_ref[...]          # (bt, R, C)
    gtsal = gts_ref[:, 0]         # (bt, R, C)  gt_s[:, 0]  (saliency map)
    fix = gts_ref[:, 1]           # (bt, R, C)  gt_s[:, 1]  (fixation map)
    mask = mask_ref[...]          # (1, R, C) or (bt, R, C); broadcasts

    # ---- pass 1: raw per-image sums (one fused elementwise sweep) ----
    s_p = _ssum(pred)             # (bt, 1, 1)
    s_g = _ssum(gtsal)
    s_f = _ssum(fix)

    pm = s_p * inv_n
    gm = s_g * inv_n

    inv_sp_eps = 1.0 / (s_p + _EPS32)   # KL pred normalizer
    inv_sg = 1.0 / s_g                  # KL target normalizer (no eps, as in torch)
    inv_sf = 1.0 / s_f                  # NSS / SMSE denominator

    # ---- pass 2: KL + centered moments / cross sums (batched over bt) ----
    dp = pred - pm
    dg = gtsal - gm

    # KL sweep is EUP-bound: 1 approx vrcp + 1 Newton step (VPU) instead of a
    # precise divide; log stays the only other EUP op.
    t = gtsal * inv_sg
    p_eps = pred * inv_sp_eps + _EPS32
    r = pl.reciprocal(p_eps, approx=True)
    r = r * (2.0 - p_eps * r)           # Newton refinement -> ~f32 accuracy
    kl_ref[...] = _ssum(t * jnp.log(t * r + _EPS32) * mask)

    s_dp2 = _ssum(dp * dp)              # (n-1) * var(pred)   (unbiased torch.std)
    s_dg2 = _ssum(dg * dg)              # (n-1) * var(gtsal)
    s_mpg = _ssum(mask * dp * dg)       # un-normalized CC numerator

    ps = jnp.sqrt(s_dp2 * inv_nm1)
    gs = jnp.sqrt(s_dg2 * inv_nm1)

    inv_ps_e32 = 1.0 / (ps + _EPS32)
    inv_ps_e6 = 1.0 / (ps + _EPS6)
    inv_gs = 1.0 / gs

    # CC partials (exact algebraic factoring of the normalized sums).
    ccn_ref[...] = s_mpg * (inv_ps_e32 * inv_gs)
    ccpp_ref[...] = s_dp2 * (inv_ps_e32 * inv_ps_e32)
    cctt_ref[...] = s_dg2 * (inv_gs * inv_gs)

    if use_smse:
        # SMSE: ((ref*fix - pred_n*fix)^2 * mask).mean / fix.mean == sum / sum(fix)
        e = (dg * inv_gs - dp * inv_ps_e6) * fix
        nss_ref[...] = _ssum(mask * e * e) * inv_sf
    else:
        # NSS: (mask * (ref_n*fix - pred_n*fix)).sum / fix.sum
        df = fix - s_f * inv_n
        s_df2 = _ssum(df * df)
        inv_fs = 1.0 / jnp.sqrt(s_df2 * inv_nm1)
        e = (df * inv_fs - dp * inv_ps_e6) * fix
        nss_ref[...] = _ssum(mask * e) * inv_sf


def saliency_loss_forward(pred, gt_s, overlap_mask, *, use_smse=False,
                          vmem_budget_bytes=32 * 1024 * 1024, max_bt=8):
    pred = pred.astype(jnp.float32)
    gt_s = gt_s.astype(jnp.float32)
    mask = overlap_mask.astype(jnp.float32)

    B, H, W = pred.shape
    assert gt_s.shape == (B, 2, H, W)
    if mask.ndim == 2:
        mask = mask[None]
    shared_mask = (mask.shape[0] == 1)
    if not shared_mask:
        assert mask.shape[0] == B
    n = H * W

    # Lane-dense layout: fold the spatial axes to (rows, 128) when possible so
    # all elementwise ops / reduces use full 8x128 vregs (contiguous reshape,
    # no HBM copy).
    if n % 128 == 0:
        R, C = n // 128, 128
    else:
        R, C = H, W
    pred = pred.reshape(B, R, C)
    gt_s = gt_s.reshape(B, 2, R, C)
    mask = mask.reshape(mask.shape[0], R, C)

    # ---- pick images/grid-step (bt) ----
    # Per-image VMEM: 2x double-buffered input blocks (pred + 2 gt_s channels
    # [+ per-image mask]) plus ~6 full-size pass-2 temporaries.
    img_bytes = R * C * 4
    per_image = (2 * (3 + (0 if shared_mask else 1)) + 6) * img_bytes
    fixed = (2 * img_bytes) if shared_mask else 0      # resident shared mask
    bt = 1
    for cand in range(1, min(B, max_bt) + 1):
        if fixed + cand * per_image <= vmem_budget_bytes:
            bt = cand
    if B >= 2:
        bt = min(bt, pl.cdiv(B, 2))    # >= 2 grid steps (megacore / v7x 2 TCs)
    grid_b = pl.cdiv(B, bt)
    Bp = grid_b * bt
    if Bp != B:
        # Pad the batch so every grid step is full; padded rows produce
        # isolated garbage partials that are sliced off below.
        padw = Bp - B
        pred = jnp.pad(pred, ((0, padw), (0, 0), (0, 0)))
        gt_s = jnp.pad(gt_s, ((0, padw), (0, 0), (0, 0), (0, 0)))
        if not shared_mask:
            mask = jnp.pad(mask, ((0, padw), (0, 0), (0, 0)))

    vmem_limit = int(min(max(fixed + bt * per_image + (8 << 20), 16 << 20),
                         48 << 20))

    mask_spec = (pl.BlockSpec((1, R, C), lambda b: (0, 0, 0)) if shared_mask
                 else pl.BlockSpec((bt, R, C), lambda b: (b, 0, 0)))

    kernel = functools.partial(_saliency_kernel, n=float(n), use_smse=use_smse)

    part_shape = jax.ShapeDtypeStruct((Bp, 1, 1), jnp.float32)
    part_spec = pl.BlockSpec((bt, 1, 1), lambda b: (b, 0, 0))

    cost = pl.CostEstimate(
        flops=int(30 * Bp * n),
        transcendentals=int(2 * Bp * n),            # log + approx reciprocal
        bytes_accessed=int(4 * (3 * Bp * n + mask.size + 5 * Bp)),
    )

    kl_p, ccn_p, ccpp_p, cctt_p, nss_p = pl.pallas_call(
        kernel,
        out_shape=(part_shape,) * 5,
        grid=(grid_b,),
        in_specs=[
            pl.BlockSpec((bt, R, C), lambda b: (b, 0, 0)),        # pred
            pl.BlockSpec((bt, 2, R, C), lambda b: (b, 0, 0, 0)),  # gt_s (one DMA)
            mask_spec,                                            # overlap mask
        ],
        out_specs=(part_spec,) * 5,
        compiler_params=pltpu.CompilerParams(
            dimension_semantics=("parallel",),
            vmem_limit_bytes=vmem_limit),
        cost_estimate=cost,
    )(pred, gt_s, mask)

    kl = kl_p[:B].mean()
    cc = 1.0 - ccn_p[:B].sum() / jnp.sqrt(ccpp_p[:B].sum() * cctt_p[:B].sum())
    nss = nss_p[:B].mean()
    return kl, cc, nss


class SaliencyLoss:
    """JAX/Pallas port of utils.saliency_losses.SaliencyLoss (no learnable params)."""

    def __init__(self, config):
        self.use_smse = config['train']['criterion']['use_smse']
        self.use_infogain = config['train']['criterion']['use_infogain']

    def __call__(self, pred, gt_s, overlap_mask):
        return saliency_loss_forward(pred, gt_s, overlap_mask,
                                     use_smse=self.use_smse)


# ---------------- pure-JAX reference (mirrors the PyTorch math) ----------------
def _reference(pred, gt_s, mask, use_smse=False):
    pred = pred.astype(jnp.float32)
    gtsal = gt_s[:, 0].astype(jnp.float32)
    fix = gt_s[:, 1].astype(jnp.float32)
    mask = mask.astype(jnp.float32)
    ax = (-2, -1)
    n = pred.shape[-2] * pred.shape[-1]

    def mstd(x):
        m = x.mean(ax, keepdims=True)
        s = jnp.sqrt(((x - m) ** 2).sum(ax, keepdims=True) / (n - 1))
        return m, s

    p = pred / (pred.sum(ax, keepdims=True) + _EPS32)
    t = gtsal / gtsal.sum(ax, keepdims=True)
    kl = (t * jnp.log(t / (p + _EPS32) + _EPS32) * mask).sum(ax).mean()

    pm, ps = mstd(pred)
    tm, ts = mstd(gtsal)
    p_n = (pred - pm) / (ps + _EPS32)
    t_n = (gtsal - tm) / ts
    cc = 1.0 - (mask * p_n * t_n).sum() / jnp.sqrt(
        (p_n * p_n).sum() * (t_n * t_n).sum())

    p_n2 = (pred - pm) / (ps + _EPS6)
    if use_smse:
        nss = ((((t_n * fix - p_n2 * fix) ** 2) * mask).mean(ax)
               / fix.mean(ax)).mean()
    else:
        fm, fs = mstd(fix)
        rn = (fix - fm) / fs
        nss = ((mask * (rn * fix - p_n2 * fix)).sum(ax) / fix.sum(ax)).mean()
    return kl, cc, nss


if __name__ == "__main__":
    key = jax.random.PRNGKey(0)

    def run_case(B, H, W, shared_mask, use_smse, case_key):
        k1, k2, k3 = jax.random.split(case_key, 3)
        pred = jax.random.uniform(k1, (B, H, W), jnp.float32,
                                  minval=0.05, maxval=1.0)
        gt_s = jax.random.uniform(k2, (B, 2, H, W), jnp.float32,
                                  minval=0.05, maxval=1.0)
        mb = 1 if shared_mask else B
        mask = (jax.random.uniform(k3, (mb, H, W)) > 0.2).astype(jnp.float32)

        config = {'train': {'criterion': {'use_smse': use_smse,
                                          'use_infogain': False}}}
        kl, cc, nss = SaliencyLoss(config)(pred, gt_s, mask)
        jax.block_until_ready((kl, cc, nss))

        rkl, rcc, rnss = _reference(pred, gt_s, mask, use_smse=use_smse)
        for got, want in ((kl, rkl), (cc, rcc), (nss, rnss)):
            np.testing.assert_allclose(np.asarray(got), np.asarray(want),
                                       rtol=2e-3, atol=2e-4)

    keys = jax.random.split(key, 3)
    run_case(2, 16, 128, True, False, keys[0])   # lane-dense, shared mask, NSS
    run_case(2, 16, 128, True, True, keys[1])    # lane-dense, shared mask, SMSE
    run_case(3, 8, 100, False, False, keys[2])   # batch pad + per-img mask + W%128!=0

    print("KERNEL_OK")
</pallas_src>

<mosaic_0001>
module attributes {stable_mosaic.version = 11 : i64} {
  func.func @_saliency_kernel(%arg0: i32, %arg1: memref<1x16x128xf32, #tpu.memory_space<vmem>>, %arg2: memref<1x2x16x128xf32, #tpu.memory_space<vmem>>, %arg3: memref<1x16x128xf32, #tpu.memory_space<vmem>>, %arg4: memref<1x1x1xf32, #tpu.memory_space<vmem>>, %arg5: memref<1x1x1xf32, #tpu.memory_space<vmem>>, %arg6: memref<1x1x1xf32, #tpu.memory_space<vmem>>, %arg7: memref<1x1x1xf32, #tpu.memory_space<vmem>>, %arg8: memref<1x1x1xf32, #tpu.memory_space<vmem>>) attributes {dimension_semantics = [#tpu.dimension_semantics<parallel>], iteration_bounds = array<i64: 2>, scalar_prefetch = 0 : i64, scratch_operands = 0 : i64, tpu.core_type = #tpu.core_type<tc>, window_params = [{transform_indices = @transform_0, window_bounds = array<i64: 1, 16, 128>}, {transform_indices = @transform_1, window_bounds = array<i64: 1, 2, 16, 128>}, {pipeline_mode = #tpu.pipeline_mode<synchronous>, transform_indices = @transform_2, window_bounds = array<i64: 1, 16, 128>}, {transform_indices = @transform_3, window_bounds = array<i64: 1, 1, 1>}, {transform_indices = @transform_4, window_bounds = array<i64: 1, 1, 1>}, {transform_indices = @transform_5, window_bounds = array<i64: 1, 1, 1>}, {transform_indices = @transform_6, window_bounds = array<i64: 1, 1, 1>}, {transform_indices = @transform_7, window_bounds = array<i64: 1, 1, 1>}]} {
    %c0 = arith.constant 0 : index
    %c0_0 = arith.constant 0 : index
    %c0_1 = arith.constant 0 : index
    %0 = vector.load %arg1[%c0, %c0_0, %c0_1] : memref<1x16x128xf32, #tpu.memory_space<vmem>>, vector<1x16x128xf32>
    %c0_2 = arith.constant 0 : index
    %c0_3 = arith.constant 0 : index
    %c0_4 = arith.constant 0 : index
    %c0_5 = arith.constant 0 : index
    %1 = vector.load %arg2[%c0_2, %c0_3, %c0_4, %c0_5] : memref<1x2x16x128xf32, #tpu.memory_space<vmem>>, vector<1x1x16x128xf32>
    %2 = vector.shape_cast %1 : vector<1x1x16x128xf32> to vector<1x16x128xf32>
    %c0_6 = arith.constant 0 : index
    %c1 = arith.constant 1 : index
    %c0_7 = arith.constant 0 : index
    %c0_8 = arith.constant 0 : index
    %3 = vector.load %arg2[%c0_6, %c1, %c0_7, %c0_8] : memref<1x2x16x128xf32, #tpu.memory_space<vmem>>, vector<1x1x16x128xf32>
    %4 = vector.shape_cast %3 : vector<1x1x16x128xf32> to vector<1x16x128xf32>
    %c0_9 = arith.constant 0 : index
    %c0_10 = arith.constant 0 : index
    %c0_11 = arith.constant 0 : index
    %5 = vector.load %arg3[%c0_9, %c0_10, %c0_11] : memref<1x16x128xf32, #tpu.memory_space<vmem>>, vector<1x16x128xf32>
    %cst = arith.constant dense<0.000000e+00> : vector<1x16xf32>
    %6 = vector.multi_reduction <add>, %0, %cst [2] : vector<1x16x128xf32> to vector<1x16xf32>
    %7 = vector.shape_cast %6 : vector<1x16xf32> to vector<1x16x1xf32>
    %cst_12 = arith.constant dense<0.000000e+00> : vector<1x1xf32>
    %8 = vector.multi_reduction <add>, %7, %cst_12 [1] : vector<1x16x1xf32> to vector<1x1xf32>
    %9 = vector.shape_cast %8 : vector<1x1xf32> to vector<1x1x1xf32>
    %cst_13 = arith.constant dense<0.000000e+00> : vector<1x16xf32>
    %10 = vector.multi_reduction <add>, %2, %cst_13 [2] : vector<1x16x128xf32> to vector<1x16xf32>
    %11 = vector.shape_cast %10 : vector<1x16xf32> to vector<1x16x1xf32>
    %cst_14 = arith.constant dense<0.000000e+00> : vector<1x1xf32>
    %12 = vector.multi_reduction <add>, %11, %cst_14 [1] : vector<1x16x1xf32> to vector<1x1xf32>
    %13 = vector.shape_cast %12 : vector<1x1xf32> to vector<1x1x1xf32>
    %cst_15 = arith.constant dense<0.000000e+00> : vector<1x16xf32>
    %14 = vector.multi_reduction <add>, %4, %cst_15 [2] : vector<1x16x128xf32> to vector<1x16xf32>
    %15 = vector.shape_cast %14 : vector<1x16xf32> to vector<1x16x1xf32>
    %cst_16 = arith.constant dense<0.000000e+00> : vector<1x1xf32>
    %16 = vector.multi_reduction <add>, %15, %cst_16 [1] : vector<1x16x1xf32> to vector<1x1xf32>
    %17 = vector.shape_cast %16 : vector<1x1xf32> to vector<1x1x1xf32>
    %cst_17 = arith.constant 4.8828125E-4 : f32
    %18 = vector.broadcast %cst_17 : f32 to vector<1x1x1xf32>
    %19 = arith.mulf %9, %18 : vector<1x1x1xf32>
    %cst_18 = arith.constant 4.8828125E-4 : f32
    %20 = vector.broadcast %cst_18 : f32 to vector<1x1x1xf32>
    %21 = arith.mulf %13, %20 : vector<1x1x1xf32>
    %cst_19 = arith.constant 1.1920929E-7 : f32
    %22 = vector.broadcast %cst_19 : f32 to vector<1x1x1xf32>
    %23 = arith.addf %9, %22 : vector<1x1x1xf32>
    %cst_20 = arith.constant 1.000000e+00 : f32
    %24 = vector.broadcast %cst_20 : f32 to vector<1x1x1xf32>
    %25 = arith.divf %24, %23 : vector<1x1x1xf32>
    %cst_21 = arith.constant 1.000000e+00 : f32
    %26 = vector.broadcast %cst_21 : f32 to vector<1x1x1xf32>
    %27 = arith.divf %26, %13 : vector<1x1x1xf32>
    %cst_22 = arith.constant 1.000000e+00 : f32
    %28 = vector.broadcast %cst_22 : f32 to vector<1x1x1xf32>
    %29 = arith.divf %28, %17 : vector<1x1x1xf32>
    %30 = vector.broadcast %19 : vector<1x1x1xf32> to vector<1x16x128xf32>
    %31 = arith.subf %0, %30 : vector<1x16x128xf32>
    %32 = vector.broadcast %21 : vector<1x1x1xf32> to vector<1x16x128xf32>
    %33 = arith.subf %2, %32 : vector<1x16x128xf32>
    %34 = vector.broadcast %27 : vector<1x1x1xf32> to vector<1x16x128xf32>
    %35 = arith.mulf %2, %34 : vector<1x16x128xf32>
    %36 = vector.broadcast %25 : vector<1x1x1xf32> to vector<1x16x128xf32>
    %37 = arith.mulf %0, %36 : vector<1x16x128xf32>
    %cst_23 = arith.constant 1.1920929E-7 : f32
    %38 = vector.broadcast %cst_23 : f32 to vector<1x16x128xf32>
    %39 = arith.addf %37, %38 : vector<1x16x128xf32>
    %40 = tpu.reciprocal %39 {approx = true} : vector<1x16x128xf32> -> vector<1x16x128xf32>
    %41 = arith.mulf %39, %40 : vector<1x16x128xf32>
    %cst_24 = arith.constant 2.000000e+00 : f32
    %42 = vector.broadcast %cst_24 : f32 to vector<1x16x128xf32>
    %43 = arith.subf %42, %41 : vector<1x16x128xf32>
    %44 = arith.mulf %40, %43 : vector<1x16x128xf32>
    %45 = arith.mulf %35, %44 : vector<1x16x128xf32>
    %cst_25 = arith.constant 1.1920929E-7 : f32
    %46 = vector.broadcast %cst_25 : f32 to vector<1x16x128xf32>
    %47 = arith.addf %45, %46 : vector<1x16x128xf32>
    %48 = math.log %47 : vector<1x16x128xf32>
    %49 = arith.mulf %35, %48 : vector<1x16x128xf32>
    %50 = arith.mulf %49, %5 : vector<1x16x128xf32>
    %cst_26 = arith.constant dense<0.000000e+00> : vector<1x16xf32>
    %51 = vector.multi_reduction <add>, %50, %cst_26 [2] : vector<1x16x128xf32> to vector<1x16xf32>
    %52 = vector.shape_cast %51 : vector<1x16xf32> to vector<1x16x1xf32>
    %cst_27 = arith.constant dense<0.000000e+00> : vector<1x1xf32>
    %53 = vector.multi_reduction <add>, %52, %cst_27 [1] : vector<1x16x1xf32> to vector<1x1xf32>
    %54 = vector.shape_cast %53 : vector<1x1xf32> to vector<1x1x1xf32>
    %c0_28 = arith.constant 0 : index
    %c0_29 = arith.constant 0 : index
    %c0_30 = arith.constant 0 : index
    %55 = vector.load %arg4[%c0_28, %c0_29, %c0_30] : memref<1x1x1xf32, #tpu.memory_space<vmem>>, vector<1x1x1xf32>
    tpu.vector_store %arg4[%c0_28, %c0_29, %c0_30], %54 {strides = array<i32>} : memref<1x1x1xf32, #tpu.memory_space<vmem>>, vector<1x1x1xf32>,
    %56 = arith.mulf %31, %31 : vector<1x16x128xf32>
    %cst_31 = arith.constant dense<0.000000e+00> : vector<1x16xf32>
    %57 = vector.multi_reduction <add>, %56, %cst_31 [2] : vector<1x16x128xf32> to vector<1x16xf32>
    %58 = vector.shape_cast %57 : vector<1x16xf32> to vector<1x16x1xf32>
    %cst_32 = arith.constant dense<0.000000e+00> : vector<1x1xf32>
    %59 = vector.multi_reduction <add>, %58, %cst_32 [1] : vector<1x16x1xf32> to vector<1x1xf32>
    %60 = vector.shape_cast %59 : vector<1x1xf32> to vector<1x1x1xf32>
    %61 = arith.mulf %33, %33 : vector<1x16x128xf32>
    %cst_33 = arith.constant dense<0.000000e+00> : vector<1x16xf32>
    %62 = vector.multi_reduction <add>, %61, %cst_33 [2] : vector<1x16x128xf32> to vector<1x16xf32>
    %63 = vector.shape_cast %62 : vector<1x16xf32> to vector<1x16x1xf32>
    %cst_34 = arith.constant dense<0.000000e+00> : vector<1x1xf32>
    %64 = vector.multi_reduction <add>, %63, %cst_34 [1] : vector<1x16x1xf32> to vector<1x1xf32>
    %65 = vector.shape_cast %64 : vector<1x1xf32> to vector<1x1x1xf32>
    %66 = arith.mulf %5, %31 : vector<1x16x128xf32>
    %67 = arith.mulf %66, %33 : vector<1x16x128xf32>
    %cst_35 = arith.constant dense<0.000000e+00> : vector<1x16xf32>
    %68 = vector.multi_reduction <add>, %67, %cst_35 [2] : vector<1x16x128xf32> to vector<1x16xf32>
    %69 = vector.shape_cast %68 : vector<1x16xf32> to vector<1x16x1xf32>
    %cst_36 = arith.constant dense<0.000000e+00> : vector<1x1xf32>
    %70 = vector.multi_reduction <add>, %69, %cst_36 [1] : vector<1x16x1xf32> to vector<1x1xf32>
    %71 = vector.shape_cast %70 : vector<1x1xf32> to vector<1x1x1xf32>
    %cst_37 = arith.constant 4.88519785E-4 : f32
    %72 = vector.broadcast %cst_37 : f32 to vector<1x1x1xf32>
    %73 = arith.mulf %60, %72 : vector<1x1x1xf32>
    %74 = math.sqrt %73 : vector<1x1x1xf32>
    %cst_38 = arith.constant 4.88519785E-4 : f32
    %75 = vector.broadcast %cst_38 : f32 to vector<1x1x1xf32>
    %76 = arith.mulf %65, %75 : vector<1x1x1xf32>
    %77 = math.sqrt %76 : vector<1x1x1xf32>
    %cst_39 = arith.constant 1.1920929E-7 : f32
    %78 = vector.broadcast %cst_39 : f32 to vector<1x1x1xf32>
    %79 = arith.addf %74, %78 : vector<1x1x1xf32>
    %cst_40 = arith.constant 1.000000e+00 : f32
    %80 = vector.broadcast %cst_40 : f32 to vector<1x1x1xf32>
    %81 = arith.divf %80, %79 : vector<1x1x1xf32>
    %cst_41 = arith.constant 9.99999997E-7 : f32
    %82 = vector.broadcast %cst_41 : f32 to vector<1x1x1xf32>
    %83 = arith.addf %74, %82 : vector<1x1x1xf32>
    %cst_42 = arith.constant 1.000000e+00 : f32
    %84 = vector.broadcast %cst_42 : f32 to vector<1x1x1xf32>
    %85 = arith.divf %84, %83 : vector<1x1x1xf32>
    %cst_43 = arith.constant 1.000000e+00 : f32
    %86 = vector.broadcast %cst_43 : f32 to vector<1x1x1xf32>
    %87 = arith.divf %86, %77 : vector<1x1x1xf32>
    %88 = arith.mulf %81, %87 : vector<1x1x1xf32>
    %89 = arith.mulf %71, %88 : vector<1x1x1xf32>
    %c0_44 = arith.constant 0 : index
    %c0_45 = arith.constant 0 : index
    %c0_46 = arith.constant 0 : index
    %90 = vector.load %arg5[%c0_44, %c0_45, %c0_46] : memref<1x1x1xf32, #tpu.memory_space<vmem>>, vector<1x1x1xf32>
    tpu.vector_store %arg5[%c0_44, %c0_45, %c0_46], %89 {strides = array<i32>} : memref<1x1x1xf32, #tpu.memory_space<vmem>>, vector<1x1x1xf32>,
    %91 = arith.mulf %81, %81 : vector<1x1x1xf32>
    %92 = arith.mulf %60, %91 : vector<1x1x1xf32>
    %c0_47 = arith.constant 0 : index
    %c0_48 = arith.constant 0 : index
    %c0_49 = arith.constant 0 : index
    %93 = vector.load %arg6[%c0_47, %c0_48, %c0_49] : memref<1x1x1xf32, #tpu.memory_space<vmem>>, vector<1x1x1xf32>
    tpu.vector_store %arg6[%c0_47, %c0_48, %c0_49], %92 {strides = array<i32>} : memref<1x1x1xf32, #tpu.memory_space<vmem>>, vector<1x1x1xf32>,
    %94 = arith.mulf %87, %87 : vector<1x1x1xf32>
    %95 = arith.mulf %65, %94 : vector<1x1x1xf32>
    %c0_50 = arith.constant 0 : index
    %c0_51 = arith.constant 0 : index
    %c0_52 = arith.constant 0 : index
    %96 = vector.load %arg7[%c0_50, %c0_51, %c0_52] : memref<1x1x1xf32, #tpu.memory_space<vmem>>, vector<1x1x1xf32>
    tpu.vector_store %arg7[%c0_50, %c0_51, %c0_52], %95 {strides = array<i32>} : memref<1x1x1xf32, #tpu.memory_space<vmem>>, vector<1x1x1xf32>,
    %cst_53 = arith.constant 4.8828125E-4 : f32
    %97 = vector.broadcast %cst_53 : f32 to vector<1x1x1xf32>
    %98 = arith.mulf %17, %97 : vector<1x1x1xf32>
    %99 = vector.broadcast %98 : vector<1x1x1xf32> to vector<1x16x128xf32>
    %100 = arith.subf %4, %99 : vector<1x16x128xf32>
    %101 = arith.mulf %100, %100 : vector<1x16x128xf32>
    %cst_54 = arith.constant dense<0.000000e+00> : vector<1x16xf32>
    %102 = vector.multi_reduction <add>, %101, %cst_54 [2] : vector<1x16x128xf32> to vector<1x16xf32>
    %103 = vector.shape_cast %102 : vector<1x16xf32> to vector<1x16x1xf32>
    %cst_55 = arith.constant dense<0.000000e+00> : vector<1x1xf32>
    %104 = vector.multi_reduction <add>, %103, %cst_55 [1] : vector<1x16x1xf32> to vector<1x1xf32>
    %105 = vector.shape_cast %104 : vector<1x1xf32> to vector<1x1x1xf32>
    %cst_56 = arith.constant 4.88519785E-4 : f32
    %106 = vector.broadcast %cst_56 : f32 to vector<1x1x1xf32>
    %107 = arith.mulf %105, %106 : vector<1x1x1xf32>
    %108 = math.sqrt %107 : vector<1x1x1xf32>
    %cst_57 = arith.constant 1.000000e+00 : f32
    %109 = vector.broadcast %cst_57 : f32 to vector<1x1x1xf32>
    %110 = arith.divf %109, %108 : vector<1x1x1xf32>
    %111 = vector.broadcast %110 : vector<1x1x1xf32> to vector<1x16x128xf32>
    %112 = arith.mulf %100, %111 : vector<1x16x128xf32>
    %113 = vector.broadcast %85 : vector<1x1x1xf32> to vector<1x16x128xf32>
    %114 = arith.mulf %31, %113 : vector<1x16x128xf32>
    %115 = arith.subf %112, %114 : vector<1x16x128xf32>
    %116 = arith.mulf %115, %4 : vector<1x16x128xf32>
    %117 = arith.mulf %5, %116 : vector<1x16x128xf32>
    %cst_58 = arith.constant dense<0.000000e+00> : vector<1x16xf32>
    %118 = vector.multi_reduction <add>, %117, %cst_58 [2] : vector<1x16x128xf32> to vector<1x16xf32>
    %119 = vector.shape_cast %118 : vector<1x16xf32> to vector<1x16x1xf32>
    %cst_59 = arith.constant dense<0.000000e+00> : vector<1x1xf32>
    %120 = vector.multi_reduction <add>, %119, %cst_59 [1] : vector<1x16x1xf32> to vector<1x1xf32>
    %121 = vector.shape_cast %120 : vector<1x1xf32> to vector<1x1x1xf32>
    %122 = arith.mulf %121, %29 : vector<1x1x1xf32>
    %c0_60 = arith.constant 0 : index
    %c0_61 = arith.constant 0 : index
    %c0_62 = arith.constant 0 : index
    %123 = vector.load %arg8[%c0_60, %c0_61, %c0_62] : memref<1x1x1xf32, #tpu.memory_space<vmem>>, vector<1x1x1xf32>
    tpu.vector_store %arg8[%c0_60, %c0_61, %c0_62], %122 {strides = array<i32>} : memref<1x1x1xf32, #tpu.memory_space<vmem>>, vector<1x1x1xf32>,
    return
  }
  func.func @transform_0(%arg0: i32) -> (i32, i32, i32) {
    %c0_i32 = arith.constant 0 : i32
    %c0_i32_0 = arith.constant 0 : i32
    %c0_i32_1 = arith.constant 0 : i32
    return %arg0, %c0_i32, %c0_i32_0 : i32, i32, i32
  }
  func.func @transform_1(%arg0: i32) -> (i32, i32, i32, i32) {
    %c0_i32 = arith.constant 0 : i32
    %c0_i32_0 = arith.constant 0 : i32
    %c0_i32_1 = arith.constant 0 : i32
    %c0_i32_2 = arith.constant 0 : i32
    return %arg0, %c0_i32, %c0_i32_0, %c0_i32_1 : i32, i32, i32, i32
  }
  func.func @transform_2(%arg0: i32) -> (i32, i32, i32) {
    %c0_i32 = arith.constant 0 : i32
    %c0_i32_0 = arith.constant 0 : i32
    %c0_i32_1 = arith.constant 0 : i32
    %c0_i32_2 = arith.constant 0 : i32
    return %c0_i32, %c0_i32_0, %c0_i32_1 : i32, i32, i32
  }
  func.func @transform_3(%arg0: i32) -> (i32, i32, i32) {
    %c0_i32 = arith.constant 0 : i32
    %c0_i32_0 = arith.constant 0 : i32
    %c0_i32_1 = arith.constant 0 : i32
    return %arg0, %c0_i32, %c0_i32_0 : i32, i32, i32
  }
  func.func @transform_4(%arg0: i32) -> (i32, i32, i32) {
    %c0_i32 = arith.constant 0 : i32
    %c0_i32_0 = arith.constant 0 : i32
    %c0_i32_1 = arith.constant 0 : i32
    return %arg0, %c0_i32, %c0_i32_0 : i32, i32, i32
  }
  func.func @transform_5(%arg0: i32) -> (i32, i32, i32) {
    %c0_i32 = arith.constant 0 : i32
    %c0_i32_0 = arith.constant 0 : i32
    %c0_i32_1 = arith.constant 0 : i32
    return %arg0, %c0_i32, %c0_i32_0 : i32, i32, i32
  }
  func.func @transform_6(%arg0: i32) -> (i32, i32, i32) {
    %c0_i32 = arith.constant 0 : i32
    %c0_i32_0 = arith.constant 0 : i32
    %c0_i32_1 = arith.constant 0 : i32
    return %arg0, %c0_i32, %c0_i32_0 : i32, i32, i32
  }
  func.func @transform_7(%arg0: i32) -> (i32, i32, i32) {
    %c0_i32 = arith.constant 0 : i32
    %c0_i32_0 = arith.constant 0 : i32
    %c0_i32_1 = arith.constant 0 : i32
    return %arg0, %c0_i32, %c0_i32_0 : i32, i32, i32
  }
}

</mosaic_0001>

<bundles_post_ra>
// kernel: tpu_custom_call.1
= control target key start
LH: loop header
LB: loop body
LE: loop exit
PB: predicated region body
PF: predicated region fallthrough
CT: control target
= control target key end

     0   :  { %s1347_s0 = inlined_call_operand.hbm [shape: f32[2,16,128], index: 0, kind: input, shape index: {}]   ;;  %s1348_s1 = inlined_call_operand.hbm [shape: f32[2,2,16,128], index: 1, kind: input, shape index: {}]   ;;  %s1349_s2 = inlined_call_operand.hbm [shape: f32[1,16,128], index: 2, kind: input, shape index: {}]   ;;  %s1350_s3 = inlined_call_operand.vmem [shape: f32[2,1,1], index: 3, kind: output, shape index: {0}]   ;;  %s1351_s4 = inlined_call_operand.vmem [shape: f32[2,1,1], index: 4, kind: output, shape index: {1}]   ;;  %s1352_s5 = inlined_call_operand.vmem [shape: f32[2,1,1], index: 5, kind: output, shape index: {2}]   ;;  %s1353_s6 = inlined_call_operand.vmem [shape: f32[2,1,1], index: 6, kind: output, shape index: {3}]   ;;  %s1354_s7 = inlined_call_operand.vmem [shape: f32[2,1,1], index: 7, kind: output, shape index: {4}]  }
   0x1   :  { %1357 = sst [smem:[#allocation10_spill]] %s1347_s0 }
   0x2   :  { %1358 = sst [smem:[#allocation11_spill]] %s1349_s2 }
   0x3   :  { %13 = vsyncpa [#allocation3], 0 }
   0x4   :  { %15 = vsyncpa [#allocation3 + $0x1], 0 }
   0x5   :  { %16 = vsyncpa [#allocation5], 0 }
   0x6   :  { %18 = vsyncpa [#allocation5 + $0x1], 0  ;;  %s1066_s24 = smov 0   ;;  %s1068_s25 = smov 0  }
   0x7   :  { %s1070_s26 = smov 0   ;;  %s1072_s27 = smov 0  }
   0x8 LB: > { %s1085_s28 = sadd.s32 4294967295, %s1019_s27   ;;  %p44_p0 = scmp.ne.s32.totalorder %s1011_s25, %s1007_s24  ;;  %s1019_s27 = sphi %s1072_s27, %s1373_s27   ;;  %s1015_s26 = sphi %s1070_s26, %s1372_s26   ;;  %s1011_s25 = sphi %s1068_s25, %s1371_s25   ;;  %s1007_s24 = sphi %s1066_s24, %s1370_s24  }
   0x9   : > { %p1355_p1 = scmp.eq.s32.totalorder %s1085_s28, 0  ;;  %p791_p2 = scmp.ge.s32.totalorder %s1019_s27, 1 }
   0xa   : > { %p232_p3 = scmp.lt.s32.totalorder %s1019_s27, 3  ;;  %s1021_s8 = smov [#allocation6]  }
   0xb   : > { %p1093_p4 = por %p1355_p1, %p44_p0  ;;  %s244_s9 = sshll.u32 %s1021_s8, 4  ;;  %s245_s9 = int_to_ptr.vmem [resolvable:$true] %s244_s9 }
   0xc   : > { %p1097_p5 = pnand %p791_p2, %p232_p3  ;;  %s1110_s11 = sadd.s32 1, %s1019_s27  }
   0xd   : > { %s1359_s29 = scalar_select %p1093_p4, 1, 0 }
   0xe   : > { %p818_p6 = pneg %p1097_p5  ;;  %s31_s12 = sadd.s32 1, %s1015_s26 }
   0xf   : > { %s28_s13 = ssub.s32 %s1019_s27, %s1110_s11  ;;  %s906_s14 = scalar_lea.vmem %s245_s9, 256 }
  0x10   : > { %p1105_p7 = pnand %p818_p6, %p1355_p1  ;;  %p907_p9 = scmp.ne.s32.totalorder %s245_s9, %s906_s14 }
  0x11   : > { %p914_p12 = scmp.lt.s32.totalorder %s245_s9, %s245_s9  ;;  %p915_p13 = scmp.lt.s32.totalorder %s906_s14, %s906_s14 }
  0x12   : > { %p897_p8 = pneg %p1105_p7 }
  0x13   : > { %p916_p0 = por %p915_p13, %p914_p12 }
  0x14   : > { %p909_p10 = pnand %p907_p9, %p897_p8 }
  0x16   : > { %p910_p11 = pneg %p909_p10 }
  0x18   : > { %p917_p2 = pnand %p916_p0, %p910_p11 }
  0x1a   : > { %920 = shalt.err (!%p917_p2)
}
  0x1b   : > { %s1022_s15 = smov 128   ;;  %s1023_s16 = smov 8  }
  0x1c   : > { %s1362_s2 = sld [smem:[#allocation11_spill]]  ;;  %p29_p3 = scmp.eq.s32.totalorder %s28_s13, 0 }
  0x1d   : > { %p38_p6 = scmp.ne.s32.totalorder %s1015_s26, %s1011_s25  ;;  %p39_p8 = scmp.eq.s32.totalorder %s1019_s27, 0 }
  0x1e   : > { %p830_p9 = scmp.lt.s32.totalorder %s1019_s27, 2  ;;  %s1133_s20 = sand.u32 1, %s1015_s26  }
  0x1f   : > { %s1130_s19 = scalar_select %p29_p3, %s1015_s26, %s31_s12  }
  0x20   : > { %p40_p10 = por %p39_p8, %p38_p6  ;;  %s794_s21 = sshll.u32 %s1133_s20, 4 }
  0x21   : > { %s808_s22 = sshll.u32 %s1019_s27, 8  ;;  %s1363_s0 = sld [smem:[#allocation10_spill]] }
  0x22   : > { %821 = dma.hbm_to_vmem [thread:$0]  (!%p1105_p7), %s1362_s2, 256, %s245_s9, [#allocation5], %s1022_s15, %s1022_s15, %s1023_s16  }
  0x23   : > { %s262_s9 = scalar_lea.vmem [#allocation2], %s794_s21  ;;  %p1144_p7 = pnand %p830_p9, %p40_p10 }
  0x24   : > { %s269_s10 = sshll.u32 %s262_s9, 4  ;;  %s259_s17 = scalar_lea.sflag [#allocation3], %s1133_s20  ;;  %s1142_s10 = int_to_ptr.vmem [resolvable:$true] %s269_s10 }
  0x25   : > { %p923_p12 = pneg %p1144_p7 }
  0x27   : > { %s1140_s8 = scalar_lea.hbm %s1363_s0, %s808_s22  ;;  %s926_s23 = scalar_lea.hbm %s1363_s0, 512 }
  0x28   : > { %s921_s18 = scalar_lea.hbm %s1140_s8, 256  ;;  %p927_p2 = scmp.lt.s32.totalorder %s1140_s8, %s1363_s0 }
  0x29   : > { %p922_p11 = scmp.ne.s32.totalorder %s1140_s8, %s921_s18  ;;  %p928_p3 = scmp.lt.s32.totalorder %s926_s23, %s921_s18 }
  0x2b   : > { %p924_p13 = pnand %p923_p12, %p922_p11  ;;  %p929_p6 = por %p928_p3, %p927_p2 }
  0x2d   : > { %p925_p0 = pneg %p924_p13 }
  0x2f   : > { %p930_p8 = pnand %p929_p6, %p925_p0 }
  0x31   : > { %933 = shalt.err (!%p930_p8)
}
  0x32   : > { %s934_s13 = scalar_lea.vmem %s1142_s10, 256  ;;  %s1024_s21 = smov [#allocation2]  }
  0x33   : > { %p935_p9 = scmp.ne.s32.totalorder %s1142_s10, %s934_s13  ;;  %s939_s22 = sshll.u32 %s1024_s21, 4  ;;  %s940_s22 = int_to_ptr.vmem [resolvable:$false] %s939_s22 }
  0x34   : > { %s941_s14 = scalar_lea.vmem %s940_s22, 512  ;;  %p942_p13 = scmp.lt.s32.totalorder %s1142_s10, %s940_s22 }
  0x35   : > { %p937_p10 = pnand %p935_p9, %p923_p12  ;;  %p943_p1 = scmp.lt.s32.totalorder %s941_s14, %s934_s13 }
  0x37   : > { %p938_p11 = pneg %p937_p10  ;;  %p944_p4 = por %p943_p1, %p942_p13 }
  0x39   : > { %p945_p2 = pnand %p944_p4, %p938_p11 }
  0x3b   : > { %948 = shalt.err (!%p945_p2)
}
  0x3c   : > { %825 = dma.hbm_to_vmem [thread:$0]  (!%p1144_p7), %s1140_s8, 256, %s1142_s10, %s259_s17, %s1022_s15, %s1022_s15, %s1023_s16  }
  0x3d   : > { %s809_s18 = sshll.u32 %s1019_s27, 9  ;;  %s1365_s24 = sshll.u32 %s1133_s20, 5 }
  0x3e   : > { %s1184_s14 = scalar_lea.hbm %s1348_s1, %s809_s18  ;;  %s283_s9 = scalar_lea.vmem [#allocation4], %s1365_s24 }
  0x3f   : > { %s290_s21 = sshll.u32 %s283_s9, 4  ;;  %s1366_s22 = sand.u32 1, %s1019_s27   ;;  %s1188_s21 = int_to_ptr.vmem [resolvable:$true] %s290_s21 }
  0x40   : > { %s280_s0 = scalar_lea.sflag [#allocation5], %s1366_s22  ;;  %s949_s2 = scalar_lea.hbm %s1184_s14, 512 }
  0x41   : > { %p950_p1 = scmp.ne.s32.totalorder %s1184_s14, %s949_s2  ;;  %s954_s17 = scalar_lea.hbm %s1348_s1, 1024 }
  0x42   : > { %p955_p3 = scmp.lt.s32.totalorder %s1184_s14, %s1348_s1  ;;  %p956_p6 = scmp.lt.s32.totalorder %s954_s17, %s949_s2 }
  0x43   : > { %p952_p4 = pnand %p950_p1, %p923_p12 }
  0x44   : > { %p957_p8 = por %p956_p6, %p955_p3 }
  0x45   : > { %p953_p0 = pneg %p952_p4 }
  0x47   : > { %p958_p9 = pnand %p957_p8, %p953_p0 }
  0x49   : > { %961 = shalt.err (!%p958_p9)
}
  0x4a   : > { %s962_s27 = scalar_lea.vmem %s1188_s21, 512  ;;  %s1025_s23 = smov [#allocation4]  }
  0x4b   : > { %p963_p10 = scmp.ne.s32.totalorder %s1188_s21, %s962_s27  ;;  %s967_s13 = sshll.u32 %s1025_s23, 4  ;;  %s968_s13 = int_to_ptr.vmem [resolvable:$false] %s967_s13 }
  0x4c   : > { %s969_s24 = scalar_lea.vmem %s968_s13, 1024  ;;  %p970_p2 = scmp.lt.s32.totalorder %s1188_s21, %s968_s13 }
  0x4d   : > { %p965_p11 = pnand %p963_p10, %p923_p12  ;;  %p971_p1 = scmp.lt.s32.totalorder %s969_s24, %s962_s27 }
  0x4f   : > { %p966_p13 = pneg %p965_p11  ;;  %p972_p4 = por %p971_p1, %p970_p2 }
  0x51   : > { %p973_p3 = pnand %p972_p4, %p966_p13 }
  0x53   : > { %976 = shalt.err (!%p973_p3)
}
  0x54   : > { %828 = dma.hbm_to_vmem [thread:$0]  (!%p1144_p7), %s1184_s14, 512, %s1188_s21, %s280_s0, %s1022_s15, %s1022_s15, %s1023_s16  }
  0x55   : > { %302 = sbr.rel (%p1097_p5) target bundleno = 616 (0x268), region = 32  ;;  %s304_s2 = sand.u32 (!%p1097_p5), 1, %s1011_s25  }
  0x56   : > { %s801_s9 = sshll.u32 (!%p1097_p5), %s304_s2, 4  ;;  %s305_s22 = scalar_lea.sflag (!%p1097_p5), [#allocation3], %s304_s2 }
  0x57   : > { %s308_s8 = scalar_lea.vmem (!%p1097_p5), [#allocation2], %s801_s9  ;;  %p1367_p12 = scmp.ne.s32.totalorder (!%p1097_p5), %s1359_s29, 0 }
  0x5a   : > { %994 = dma.done.wait (%p1367_p12), %s305_s22, 256  }
  0x5b   : > { %996 = vsyncadd (%p1367_p12), %s305_s22, 4294967040  ;;  %s313_s12 = sand.u32 1, %s1085_s28   ;;  %s802_s10 = sshll.u32 %s304_s2, 5 }
  0x5c   : > { %s314_s17 = scalar_lea.sflag [#allocation5], %s313_s12  ;;  %s317_s0 = scalar_lea.vmem [#allocation4], %s802_s10 }
  0x5d   : > { %998 = dma.done.wait (%p1367_p12), %s314_s17, 512  }
  0x5e   : > { %1000 = vsyncadd (%p1367_p12), %s314_s17, 4294966784  ;;  %p1368_p5 = scmp.eq.s32.totalorder %s1085_s28, 0 }
  0x60   : > { %1002 = dma.done.wait (%p1368_p5), [#allocation5], 256   ;;  %p1369_p7 = pmov %p1368_p5 }
  0x61   : > { %v1233_v0 = vld [vmem:[%s317_s0 + $0x10] sm:$0xff]  ;;  %v1239_v2 = vld [vmem:[%s317_s0 + $0x18] sm:$0xff]  ;;  %v1245_v4 = vld [vmem:[%s317_s0 + $0x8] sm:$0xff]  ;;  %p367_p0 = scmp.lt.s32.totalorder %s1085_s28, 1  ;;  %vm474_vm6 = vcmask 0  }
  0x62   : > { %1004 = vsyncadd (%p1369_p7), [#allocation5], 4294967040  ;;  %v1235_v1 = vld [vmem:[%s308_s8] sm:$0xff]  ;;  %413 = vadd.xlane.f32.xlu1 %v1233_v0  ;;  %v1241_v3 = vld [vmem:[%s308_s8 + $0x8] sm:$0xff] }
  0x63   : > { %391 = vadd.xlane.f32.xlu0 %v1235_v1  ;;  %v1247_v5 = vld [vmem:[%s317_s0] sm:$0xff]  ;;  %v1276_v49 = vld [vmem:[#allocation6 + $0x8] sm:$0xff]  ;;  %s1375_s28 = smov (!%p367_p0, %s1085_s28), 1 }
  0x64   : > { %v1278_v50 = vld [vmem:[#allocation6] sm:$0xff]  ;;  %s375_s15 = scalar_lea.vmem %s1352_s5, %s1375_s28  ;;  %s378_s21 = scalar_lea.vmem %s1353_s6, %s1375_s28 }
  0x65   : > { %s372_s27 = scalar_lea.vmem %s1351_s4, %s1375_s28  ;;  %s381_s24 = scalar_lea.vmem %s1354_s7, %s1375_s28 }
  0x66   : > { %415 = vadd.xlane.f32.xlu1 %v1239_v2  ;;  %s369_s22 = scalar_lea.vmem %s1350_s3, %s1375_s28 }
  0x67   : > { %393 = vadd.xlane.f32.xlu0 %v1241_v3 }
  0x6a   : > { %404 = vadd.xlane.f32.xlu1 %v1245_v4 }
  0x6b   : > { %402 = vadd.xlane.f32.xlu0 %v1247_v5 }
  0xeb   : > { %v414_v6 = vpop.xlane.xlu1 %413 }
  0xec   : > { %v392_v7 = vpop.xlane.xlu0 %391 }
  0xef   : > { %v416_v8 = vpop.xlane.xlu1 %415 }
  0xf0   : > { %v394_v9 = vpop.xlane.xlu0 %393  ;;  %v417_v10 = vadd.f32 %v416_v8, %v414_v6 }
  0xf1   : > { %v395_v11 = vadd.f32 %v394_v9, %v392_v7 }
  0xf2   : > { %v418_v12 = vrot.slane %v417_v10, 4 }
  0xf3   : > { %v396_v13 = vrot.slane %v395_v11, 4  ;;  %v405_v14 = vpop.xlane.xlu1 %404 }
  0xf4   : > { %v403_v15 = vpop.xlane.xlu0 %402  ;;  %v419_v16 = vadd.f32 %v418_v12, %v417_v10 }
  0xf5   : > { %v397_v17 = vadd.f32 %v396_v13, %v395_v11  ;;  %v406_v18 = vadd.f32 %v405_v14, %v403_v15 }
  0xf6   : > { %v420_v19 = vrot.slane %v419_v16, 2 }
  0xf7   : > { %v398_v20 = vrot.slane %v397_v17, 2  ;;  %v407_v21 = vrot.slane %v406_v18, 4 }
  0xf8   : > { %v421_v22 = vadd.f32 %v420_v19, %v419_v16 }
  0xf9   : > { %v399_v23 = vadd.f32 %v398_v20, %v397_v17  ;;  %v408_v24 = vadd.f32 %v407_v21, %v406_v18 }
  0xfa   : > { %v422_v25 = vrot.slane %v421_v22, 1 }
  0xfb   : > { %v400_v26 = vrot.slane %v399_v23, 1  ;;  %v409_v27 = vrot.slane %v408_v24, 2 }
  0xfc   : > { %v1251_v28 = vadd.f32 %v422_v25, %v421_v22 }
  0xfd   : > { %v401_v29 = vadd.f32 %v400_v26, %v399_v23  ;;  %v410_v30 = vadd.f32 %v409_v27, %v408_v24 }
  0xfe   : > { %v550_v34 = vmul.f32 0.00048828125, %v1251_v28 }
  0xff   : > { %v426_v31 = vadd.f32 1.1920929e-07, %v401_v29  ;;  %v411_v32 = vrot.slane %v410_v30, 1  ;;  %v424_v33 = vmul.f32 0.00048828125, %v401_v29 }
 0x100   : > { %v1261_v38 = vsub.f32 %v1239_v2, %v550_v34  ;;  %v1268_v41 = vsub.f32 %v1233_v0, %v550_v34 }
 0x101   : > { %867 = vrcp.f32 %v426_v31  ;;  %v412_v35 = vadd.f32 %v411_v32, %v410_v30  ;;  %v1255_v36 = vsub.f32 %v1241_v3, %v424_v33  ;;  %v1258_v37 = vsub.f32 %v1235_v1, %v424_v33 }
 0x102   : > { %v554_v43 = vmul.f32 %v1261_v38, %v1261_v38  ;;  %v553_v44 = vmul.f32 %v1268_v41, %v1268_v41 }
 0x103   : > { %v477_v39 = vmul.f32 %v1255_v36, %v1255_v36  ;;  %v476_v40 = vmul.f32 %v1258_v37, %v1258_v37  ;;  %v425_v42 = vmul.f32 0.00048828125, %v412_v35  ;;  %v503_v51 = vmul.f32 %v1255_v36, %v1276_v49 }
 0x104   : > { %v502_v52 = vmul.f32 %v1258_v37, %v1278_v50  ;;  %869 = vrcp.f32 %v412_v35 }
 0x105   : > { %480 = vadd.xlane.f32.xlu1 %v477_v39  ;;  %478 = vadd.xlane.f32.xlu0 %v476_v40  ;;  %v436_v45 = vsub.f32 %v1245_v4, %v425_v42  ;;  %v435_v46 = vsub.f32 %v1247_v5, %v425_v42 }
 0x107   : > { %v490_v47 = vmul.f32 %v436_v45, %v436_v45  ;;  %v489_v48 = vmul.f32 %v435_v46, %v435_v46  ;;  %v505_v54 = vmul.f32 %v503_v51, %v436_v45  ;;  %v504_v55 = vmul.f32 %v502_v52, %v435_v46 }
 0x109   : > { %557 = vadd.xlane.f32.xlu1 %v554_v43  ;;  %555 = vadd.xlane.f32.xlu0 %v553_v44 }
 0x10d   : > { %493 = vadd.xlane.f32.xlu1 %v490_v47  ;;  %491 = vadd.xlane.f32.xlu0 %v489_v48 }
 0x10e   : > { %v868_v53 = vpop.eup %867 }
 0x10f   : > { %v440_v56 = vmul.f32 %v868_v53, %v1241_v3  ;;  %v439_v57 = vmul.f32 %v868_v53, %v1235_v1 }
 0x111   : > { %508 = vadd.xlane.f32.xlu1 %v505_v54  ;;  %506 = vadd.xlane.f32.xlu0 %v504_v55  ;;  %v442_v58 = vadd.f32 1.1920929e-07, %v440_v56  ;;  %v441_v59 = vadd.f32 1.1920929e-07, %v439_v57  ;;  %v870_v60 = vpop.eup %869 }
 0x112   : > { %v438_v7 = vmul.f32 %v870_v60, %v1245_v4  ;;  %v437_v9 = vmul.f32 %v870_v60, %v1247_v5 }
 0x113   : > { %871 = vrcp.f32 %v442_v58 }
 0x114   : > { %873 = vrcp.f32 %v441_v59 }
 0x120   : > { %v872_v61 = vpop.eup %871 }
 0x121   : > { %v874_v62 = vpop.eup %873  ;;  %v446_v63 = vmul.f32 %v872_v61, %v442_v58 }
 0x122   : > { %v445_v6 = vmul.f32 %v874_v62, %v441_v59 }
 0x123   : > { %v448_v8 = vsub.f32 2.0, %v446_v63 }
 0x124   : > { %v447_v3 = vsub.f32 2.0, %v445_v6 }
 0x125   : > { %v450_v10 = vmul.f32 %v872_v61, %v448_v8 }
 0x126   : > { %v449_v1 = vmul.f32 %v874_v62, %v447_v3 }
 0x127   : > { %v452_v11 = vmul.f32 %v450_v10, %v438_v7 }
 0x128   : > { %v451_v12 = vmul.f32 %v449_v1, %v437_v9 }
 0x129   : > { %v454_v13 = vadd.f32 1.1920929e-07, %v452_v11 }
 0x12a   : > { %v453_v14 = vadd.f32 1.1920929e-07, %v451_v12 }
 0x12b   : > { %875 = vlog2.f32 %v454_v13 }
 0x12c   : > { %877 = vlog2.f32 %v453_v14 }
 0x138   : > { %v876_v15 = vpop.eup %875 }
 0x139   : > { %v878_v16 = vpop.eup %877  ;;  %v458_v17 = vmul.f32 0.6931472, %v876_v15 }
 0x13a   : > { %v456_v18 = vmul.f32 0.6931472, %v878_v16 }
 0x13b   : > { %v1288_v19 = vmul.f32 %v458_v17, %v438_v7 }
 0x13c   : > { %v1290_v20 = vmul.f32 %v456_v18, %v437_v9 }
 0x18e   : > { %v481_v4 = vpop.xlane.xlu1 %480  ;;  %v479_v21 = vpop.xlane.xlu0 %478 }
 0x18f   : > { %v482_v5 = vadd.f32 %v481_v4, %v479_v21 }
 0x191   : > { %v483_v22 = vrot.slane %v482_v5, 4 }
 0x192   : > { %v558_v23 = vpop.xlane.xlu1 %557  ;;  %v556_v24 = vpop.xlane.xlu0 %555 }
 0x193   : > { %v484_v25 = vadd.f32 %v483_v22, %v482_v5  ;;  %v559_v26 = vadd.f32 %v558_v23, %v556_v24 }
 0x195   : > { %v485_v27 = vrot.slane %v484_v25, 2  ;;  %v560_v29 = vrot.slane %v559_v26, 4 }
 0x196   : > { %v494_v30 = vpop.xlane.xlu1 %493  ;;  %v492_v31 = vpop.xlane.xlu0 %491 }
 0x197   : > { %v486_v32 = vadd.f32 %v485_v27, %v484_v25  ;;  %v561_v33 = vadd.f32 %v560_v29, %v559_v26  ;;  %v495_v34 = vadd.f32 %v494_v30, %v492_v31 }
 0x199   : > { %v487_v35 = vrot.slane %v486_v32, 1  ;;  %v562_v39 = vrot.slane %v561_v33, 2  ;;  %v496_v40 = vrot.slane %v495_v34, 4 }
 0x19a   : > { %v509_v57 = vpop.xlane.xlu1 %508  ;;  %v507_v58 = vpop.xlane.xlu0 %506 }
 0x19b   : > { %v488_v42 = vadd.f32 %v487_v35, %v486_v32  ;;  %v563_v43 = vadd.f32 %v562_v39, %v561_v33  ;;  %v497_v44 = vadd.f32 %v496_v40, %v495_v34  ;;  %v510_v62 = vadd.f32 %v509_v57, %v507_v58 }
 0x19d   : > { %v517_v45 = vmul.f32 0.0004885198, %v488_v42  ;;  %v564_v46 = vrot.slane %v563_v43, 1  ;;  %v498_v47 = vrot.slane %v497_v44, 2  ;;  %v511_v10 = vrot.slane %v510_v62, 4 }
 0x19f   : > { %879 = vrsqrt.f32 %v517_v45  ;;  %v565_v48 = vadd.f32 %v564_v46, %v563_v43  ;;  %v499_v51 = vadd.f32 %v498_v47, %v497_v44  ;;  %vm520_vm0 = vcmp.eq.f32.partialorder %v517_v45, inf }
 0x1a0   : > { %v523_v60 = vand.u32 2147483648, %v517_v45  ;;  %vm522_vm1 = vcmp.eq.f32.partialorder %v517_v45, 0.0  ;;  %v512_v15 = vadd.f32 %v511_v10, %v510_v62 }
 0x1a1   : > { %v566_v52 = vmul.f32 0.0004885198, %v565_v48  ;;  %v500_v53 = vrot.slane %v499_v51, 1 }
 0x1a2   : > { %v513_v18 = vrot.slane %v512_v15, 2 }
 0x1a3   : > { %881 = vrsqrt.f32 %v566_v52  ;;  %v501_v54 = vadd.f32 %v500_v53, %v499_v51  ;;  %vm569_vm2 = vcmp.eq.f32.partialorder %v566_v52, inf  ;;  %v572_v3 = vand.u32 2147483648, %v566_v52 }
 0x1a4   : > { %vm571_vm3 = vcmp.eq.f32.partialorder %v566_v52, 0.0  ;;  %v514_v4 = vadd.f32 %v513_v18, %v512_v15 }
 0x1a5   : > { %v525_v55 = vmul.f32 0.0004885198, %v501_v54 }
 0x1a6   : > { %v515_v25 = vrot.slane %v514_v4, 1 }
 0x1a7   : > { %883 = vrsqrt.f32 %v525_v55  ;;  %vm528_vm4 = vcmp.eq.f32.partialorder %v525_v55, inf  ;;  %v531_v12 = vand.u32 2147483648, %v525_v55  ;;  %vm530_vm5 = vcmp.eq.f32.partialorder %v525_v55, 0.0 }
 0x1a8   : > { %v516_v34 = vadd.f32 %v515_v25, %v514_v4 }
 0x1ac   : > { %v880_v56 = vpop.eup %879 }
 0x1ad   : > { %v519_v59 = vmul.f32 %v880_v56, %v517_v45 }
 0x1af   : > { %v521_v61 = vsel %vm520_vm0, %v517_v45, %v519_v59 }
 0x1b0   : > { %v524_v63 = vsel %vm522_vm1, %v523_v60, %v521_v61  ;;  %v882_v6 = vpop.eup %881 }
 0x1b1   : > { %v533_v7 = vadd.f32 1.1920929e-07, %v524_v63  ;;  %v536_v8 = vadd.f32 1e-06, %v524_v63  ;;  %v568_v9 = vmul.f32 %v882_v6, %v566_v52 }
 0x1b3   : > { %885 = vrcp.f32 %v533_v7  ;;  %v570_v1 = vsel %vm569_vm2, %v566_v52, %v568_v9 }
 0x1b4   : > { %887 = vrcp.f32 %v536_v8  ;;  %v884_v11 = vpop.eup %883  ;;  %v573_v13 = vsel %vm571_vm3, %v572_v3, %v570_v1 }
 0x1b5   : > { %v527_v14 = vmul.f32 %v884_v11, %v525_v55  ;;  %889 = vrcp.f32 %v573_v13 }
 0x1b7   : > { %v529_v16 = vsel %vm528_vm4, %v525_v55, %v527_v14 }
 0x1b8   : > { %v532_v17 = vsel %vm530_vm5, %v531_v12, %v529_v16 }
 0x1b9   : > { %891 = vrcp.f32 %v532_v17 }
 0x1ba   : > { %893 = vrcp.f32 %v1251_v28 }
 0x1c0   : > { %v886_v21 = vpop.eup %885 }
 0x1c1   : > { %v888_v5 = vpop.eup %887  ;;  %v544_v22 = vmul.f32 %v886_v21, %v886_v21 }
 0x1c2   : > { %v890_v23 = vpop.eup %889  ;;  %v579_v27 = vmul.f32 %v888_v5, %v1255_v36  ;;  %v578_v30 = vmul.f32 %v888_v5, %v1258_v37 }
 0x1c3   : > { %v545_v24 = vmul.f32 %v544_v22, %v488_v42  ;;  %v577_v26 = vmul.f32 %v890_v23, %v1261_v38  ;;  %v576_v29 = vmul.f32 %v890_v23, %v1268_v41 }
 0x1c5   : > { %546 = vst.msk [vmem:[%s375_s15] sm:$0x1] %vm474_vm6, %v545_v24  ;;  %v581_v31 = vsub.f32 %v577_v26, %v579_v27  ;;  %v580_v32 = vsub.f32 %v576_v29, %v578_v30 }
 0x1c6   : > { %v892_v33 = vpop.eup %891 }
 0x1c7   : > { %v547_v35 = vmul.f32 %v892_v33, %v892_v33  ;;  %v541_v39 = vmul.f32 %v892_v33, %v886_v21  ;;  %v583_v40 = vmul.f32 %v1239_v2, %v581_v31  ;;  %v582_v42 = vmul.f32 %v1233_v0, %v580_v32  ;;  %v894_v57 = vpop.eup %893 }
 0x1c8   : > { %v462_v0 = vmul.f32 %v1288_v19, %v1276_v49  ;;  %v461_v2 = vmul.f32 %v1290_v20, %v1278_v50 }
 0x1c9   : > { %v548_v36 = vmul.f32 %v547_v35, %v501_v54  ;;  %v542_v37 = vmul.f32 %v541_v39, %v516_v34  ;;  %v585_v38 = vmul.f32 %v583_v40, %v1276_v49  ;;  %v584_v41 = vmul.f32 %v582_v42, %v1278_v50 }
 0x1cb   : > { %549 = vst.msk [vmem:[%s378_s21] sm:$0x1] %vm474_vm6, %v548_v36  ;;  %543 = vst.msk [vmem:[%s372_s27] sm:$0x1] %vm474_vm6, %v542_v37  ;;  %588 = vadd.xlane.f32.xlu1 %v585_v38  ;;  %586 = vadd.xlane.f32.xlu0 %v584_v41 }
 0x1cf   : > { %465 = vadd.xlane.f32.xlu1 %v462_v0  ;;  %463 = vadd.xlane.f32.xlu0 %v461_v2 }
 0x254   : > { %v589_v43 = vpop.xlane.xlu1 %588  ;;  %v587_v44 = vpop.xlane.xlu0 %586 }
 0x255   : > { %v590_v45 = vadd.f32 %v589_v43, %v587_v44 }
 0x257   : > { %v591_v46 = vrot.slane %v590_v45, 4 }
 0x258   : > { %v466_v47 = vpop.xlane.xlu1 %465  ;;  %v464_v48 = vpop.xlane.xlu0 %463 }
 0x259   : > { %v592_v51 = vadd.f32 %v591_v46, %v590_v45  ;;  %v467_v52 = vadd.f32 %v466_v47, %v464_v48 }
 0x25b   : > { %v593_v53 = vrot.slane %v592_v51, 2  ;;  %v468_v54 = vrot.slane %v467_v52, 4 }
 0x25d   : > { %v594_v49 = vadd.f32 %v593_v53, %v592_v51  ;;  %v469_v19 = vadd.f32 %v468_v54, %v467_v52 }
 0x25f   : > { %v595_v55 = vrot.slane %v594_v49, 1  ;;  %v470_v50 = vrot.slane %v469_v19, 2 }
 0x261   : > { %v596_v20 = vadd.f32 %v595_v55, %v594_v49  ;;  %v471_v56 = vadd.f32 %v470_v50, %v469_v19 }
 0x263   : > { %v597_v28 = vmul.f32 %v894_v57, %v596_v20  ;;  %v472_v58 = vrot.slane %v471_v56, 1 }
 0x265   : > { %598 = vst.msk [vmem:[%s381_s24] sm:$0x1] %vm474_vm6, %v597_v28  ;;  %v473_v59 = vadd.f32 %v472_v58, %v471_v56 }
 0x267   : > { %475 = vst.msk [vmem:[%s369_s22] sm:$0x1] %vm474_vm6, %v473_v59 }
 0x268 PF: > { %p21_p6 = scmp.ge.s32.totalorder %s1110_s11, 4   ;;  %s1370_s24 = smov %s1011_s25 }
 0x269   : > { %s1371_s25 = smov %s1015_s26  ;;  %s1372_s26 = smov %s1130_s19 }
 0x26a   : > { %s1373_s27 = smov %s1110_s11  ;;  %23 = sbr.rel (!%p21_p6) target bundleno = 8 (0x8), region = 138 }
 0x26f   :  { %664 = vsyncpa [#allocation3], 1 }
 0x270   :  { %666 = vsyncpa [#allocation3 + $0x1], 1 }
 0x271   :  { %667 = vsyncpa [#allocation5], 1 }
 0x272   :  { %669 = vsyncpa [#allocation5 + $0x1], 1 }

</bundles_post_ra>
